<compile_context>
chip_gen: v6e
topology: v6e:2x2x1
jax: 0.10.0
libtpu: 0.0.40
codegen_flags: <defaults>
</compile_context>

<pallas_src>
import math
import functools

import jax
import jax.numpy as jnp
from jax import lax
from jax.experimental import pallas as pl
from jax.experimental.pallas import tpu as pltpu


_LANE = 128  # lane width: last-dim tiles should be multiples of this

# Contract x's K (dim 1) with weight's K (dim 1): (tm, tk) x (tn, tk) -> (tm, tn).
# Same transposed-RHS contraction the reference flash-attention kernels use
# (einsum 'bqd,bkd->bqk'); Mosaic lowers it to an MXU matmul with a transposed
# weight push, so no per-call weight.T in HBM and no per-tile XLU transpose.
_NT_DIMS = (((1,), (1,)), ((), ()))


def _cdiv(a, b):
    return (a + b - 1) // b


def _round_up(a, b):
    return _cdiv(a, b) * b


def _vmem_phys_bytes():
    """Physical per-core VMEM; falls back to the most restrictive gen (v7x)."""
    try:
        info_fn = getattr(pltpu, "get_tpu_info", None)
        if info_fn is not None:
            cap = getattr(info_fn(), "vmem_capacity_bytes", None)
            if cap:
                return int(cap)
    except Exception:
        pass
    return 64 << 20  # v7x per-TensorCore VMEM


def _make_proj_kernel(*, has_bias, multi_k, use_scratch, tk, k_valid):
    """Build a kernel body specialized for the static configuration."""
    mask_k_tail = k_valid != tk  # last K block is partial -> zero its lanes

    def kernel(*refs):
        refs = list(refs)
        x_ref = refs.pop(0)
        w_ref = refs.pop(0)
        b_ref = refs.pop(0) if has_bias else None
        o_ref = refs.pop(0)
        acc_ref = refs.pop(0) if use_scratch else None

        x = x_ref[...]
        w = w_ref[...]

        if mask_k_tail:
            # VMEM lanes past the end of K are uninitialized (may hold
            # NaN/Inf): zero BOTH operands before they reach the MXU.
            if multi_k:
                k = pl.program_id(2)
                valid = jnp.where(k == pl.num_programs(2) - 1, k_valid, tk)
            else:
                valid = k_valid
            keep = lax.broadcasted_iota(jnp.int32, (1, tk), 1) < valid
            x = jnp.where(keep, x, jnp.zeros_like(x))
            w = jnp.where(keep, w, jnp.zeros_like(w))

        part = lax.dot_general(
            x, w, dimension_numbers=_NT_DIMS,
            preferred_element_type=jnp.float32)

        def _bias_f32():
            return b_ref[...].astype(jnp.float32)

        if not multi_k:
            if has_bias:
                part = part + _bias_f32()
            o_ref[...] = part.astype(o_ref.dtype)
            return

        k = pl.program_id(2)
        last = pl.num_programs(2) - 1

        if use_scratch:
            # Narrow output dtype: accumulate in an f32 VMEM scratch.
            @pl.when(k == 0)
            def _():
                acc_ref[...] = part

            @pl.when(k > 0)
            def _():
                acc_ref[...] += part

            @pl.when(k == last)
            def _():
                out = acc_ref[...]
                if has_bias:
                    out = out + _bias_f32()
                o_ref[...] = out.astype(o_ref.dtype)
        else:
            # f32 output: its block index is constant over k, so it stays
            # resident in VMEM -- accumulate straight into it (no scratch).
            @pl.when(k == 0)
            def _():
                if has_bias:
                    o_ref[...] = part + _bias_f32()
                else:
                    o_ref[...] = part

            @pl.when(k > 0)
            def _():
                o_ref[...] += part

    return kernel


@functools.partial(jax.jit, static_argnames=("tm", "tn", "tk", "prefer_full_k"))
def projection_forward(x, weight, bias=None, *, tm=512, tn=512, tk=1024,
                       prefer_full_k=True):
    """y = x @ weight.T (+ bias); x: (*, H_in), weight: (H_out, H_in)."""
    *lead, h_in = x.shape
    h_out = weight.shape[0]
    m = math.prod(lead) if lead else 1
    has_bias = bias is not None
    out_dtype = x.dtype

    x2d = x.reshape(m, h_in)

    # ---------------------------------------------------------------- tiles
    sub = 16 if out_dtype == jnp.bfloat16 else 8   # bf16 packs 2 rows/sublane
    m_cover = _round_up(m, sub)
    n_cover = _round_up(h_out, _LANE)
    k_cover = _round_up(h_in, _LANE)

    tm = max(sub, min(tm, m_cover))
    tn = max(_LANE, min(tn, n_cover))

    # Decode / small-M regime: the weight is the dominant HBM stream, so make
    # its tiles wide and lane-dense to stay near the HBM roofline.
    if m_cover <= 256:
        tn = max(tn, min(1024, n_cover))

    # v7x has 2 TensorCores/chip: for large problems guarantee >= 2 blocks
    # along a "parallel" grid axis so both cores get work.
    if _cdiv(m, tm) * _cdiv(h_out, tn) == 1:
        if h_out >= 512:
            tn = _round_up(_cdiv(h_out, 2), _LANE)
        elif m >= 512:
            tm = _round_up(_cdiv(m, 2), sub)

    x_it = x2d.dtype.itemsize
    w_it = weight.dtype.itemsize
    o_it = out_dtype.itemsize
    b_it = bias.dtype.itemsize if has_bias else 0

    phys_vmem = _vmem_phys_bytes()
    tile_budget = (phys_vmem * 3) // 4   # headroom for compiler scratch

    def footprint(tk_, with_scratch):
        f = 2 * tm * tk_ * x_it + 2 * tn * tk_ * w_it + 2 * tm * tn * o_it
        if has_bias:
            f += 2 * tn * b_it
        if with_scratch:
            f += tm * tn * 4
        return f

    # Prefer a single-shot K (no reduction axis, no accumulator state)
    # whenever the double-buffered full-K panels fit the VMEM budget.
    if prefer_full_k and footprint(k_cover, False) <= tile_budget:
        tk = k_cover
    else:
        tk = max(_LANE, min(tk, k_cover))
        while tk > _LANE and footprint(tk, True) > tile_budget:
            tk = max(_LANE, _round_up(tk // 2, _LANE))
        while tn > _LANE and footprint(tk, True) > tile_budget:
            tn = max(_LANE, _round_up(tn // 2, _LANE))
        while tm > sub and footprint(tk, True) > tile_budget:
            tm = max(sub, _round_up(tm // 2, sub))

    nk = _cdiv(h_in, tk)
    k_valid = h_in - (nk - 1) * tk          # valid lanes in the last K block
    multi_k = nk > 1
    use_scratch = multi_k and out_dtype != jnp.float32

    fp = footprint(tk, use_scratch)
    vmem_limit = int(min(max(2 * fp, fp + (4 << 20), 32 << 20),
                         phys_vmem - (4 << 20)))

    cost = pl.CostEstimate(
        flops=2 * m * h_in * h_out,
        transcendentals=0,
        bytes_accessed=m * h_in * x_it + h_out * h_in * w_it
        + m * h_out * o_it + (h_out * b_it if has_bias else 0),
    )

    inputs = [x2d, weight]
    if has_bias:
        inputs.append(bias.reshape(1, h_out))

    if multi_k:
        # NOTE(v5e): if the xprof trace shows exposed weight DMA, deepen the
        # weight stream with pipeline_mode=pl.Buffered(3) on this BlockSpec.
        in_specs = [
            pl.BlockSpec((tm, tk), lambda i, j, k: (i, k)),   # x tile
            pl.BlockSpec((tn, tk), lambda i, j, k: (j, k)),   # W tile (no .T)
        ]
        if has_bias:
            in_specs.append(pl.BlockSpec((1, tn), lambda i, j, k: (0, j)))
        out_specs = pl.BlockSpec((tm, tn), lambda i, j, k: (i, j))
        grid = (_cdiv(m, tm), _cdiv(h_out, tn), nk)
        dims = ("parallel", "parallel", "arbitrary")
        scratch = [pltpu.VMEM((tm, tn), jnp.float32)] if use_scratch else []
    else:
        in_specs = [
            pl.BlockSpec((tm, tk), lambda i, j: (i, 0)),
            pl.BlockSpec((tn, tk), lambda i, j: (j, 0)),
        ]
        if has_bias:
            in_specs.append(pl.BlockSpec((1, tn), lambda i, j: (0, j)))
        out_specs = pl.BlockSpec((tm, tn), lambda i, j: (i, j))
        grid = (_cdiv(m, tm), _cdiv(h_out, tn))
        dims = ("parallel", "parallel")
        scratch = []

    kernel = _make_proj_kernel(
        has_bias=has_bias, multi_k=multi_k, use_scratch=use_scratch,
        tk=tk, k_valid=k_valid)

    out2d = pl.pallas_call(
        kernel,
        out_shape=jax.ShapeDtypeStruct((m, h_out), out_dtype),
        grid_spec=pltpu.PrefetchScalarGridSpec(
            num_scalar_prefetch=0,
            grid=grid,
            in_specs=in_specs,
            out_specs=out_specs,
            scratch_shapes=scratch,
        ),
        compiler_params=pltpu.CompilerParams(
            dimension_semantics=dims,
            vmem_limit_bytes=vmem_limit,
        ),
        cost_estimate=cost,
    )(*inputs)

    return out2d.reshape(*lead, h_out)


def init_projection_params(key, input_dim, output_dim, dtype=jnp.float32):
    """Deterministic kaiming-uniform(a=sqrt(5)) init, like fairseq2 Linear."""
    wkey, bkey = jax.random.split(key)
    a = math.sqrt(5.0)
    gain = math.sqrt(2.0 / (1.0 + a * a))
    w_bound = gain * math.sqrt(3.0 / input_dim)
    weight = jax.random.uniform(
        wkey, (output_dim, input_dim), dtype, minval=-w_bound, maxval=w_bound
    )
    b_bound = 1.0 / math.sqrt(input_dim)
    bias = jax.random.uniform(
        bkey, (output_dim,), dtype, minval=-b_bound, maxval=b_bound
    )
    return weight, bias


if __name__ == "__main__":
    key = jax.random.PRNGKey(0)
    kx, kp = jax.random.split(key)

    batch, seq = 2, 8
    input_dim, output_dim = 128, 128   # H_in, H_out

    x = jax.random.normal(kx, (batch, seq, input_dim), dtype=jnp.float32)
    weight, bias = init_projection_params(kp, input_dim, output_dim)

    # main path (single-shot K, bias, f32)
    y = jax.block_until_ready(projection_forward(x, weight, bias))
    ref = x @ weight.T + bias
    assert y.shape == (batch, seq, output_dim)
    assert jnp.allclose(y, ref, atol=1e-4, rtol=1e-4)

    # no-bias variant
    y_nb = jax.block_until_ready(projection_forward(x, weight))
    assert jnp.allclose(y_nb, x @ weight.T, atol=1e-4, rtol=1e-4)

    # ragged K: exercises in-kernel K-tail masking (no wrapper jnp.pad)
    k2 = 96
    x2 = jax.random.normal(kx, (batch, seq, k2), dtype=jnp.float32)
    w2, b2 = init_projection_params(kp, k2, output_dim)
    y2 = jax.block_until_ready(projection_forward(x2, w2, b2))
    assert jnp.allclose(y2, x2 @ w2.T + b2, atol=1e-4, rtol=1e-4)

    # forced multi-K path, f32 output (accumulates into resident output block)
    k3 = 384
    x3 = jax.random.normal(kx, (batch, seq, k3), dtype=jnp.float32)
    w3, b3 = init_projection_params(kp, k3, output_dim)
    y3 = jax.block_until_ready(
        projection_forward(x3, w3, b3, tk=128, prefer_full_k=False))
    assert jnp.allclose(y3, x3 @ w3.T + b3, atol=1e-4, rtol=1e-4)

    # forced multi-K path, bf16 output (f32 VMEM scratch accumulator)
    xb, wb, bb = (x3.astype(jnp.bfloat16), w3.astype(jnp.bfloat16),
                  b3.astype(jnp.bfloat16))
    yb = jax.block_until_ready(
        projection_forward(xb, wb, bb, tk=128, prefer_full_k=False))
    refb = (xb.astype(jnp.float32) @ wb.astype(jnp.float32).T
            + bb.astype(jnp.float32)).astype(jnp.bfloat16)
    assert jnp.allclose(yb.astype(jnp.float32), refb.astype(jnp.float32),
                        atol=5e-2, rtol=5e-2)

    print("KERNEL_OK")
</pallas_src>

<mosaic_0001>
module attributes {stable_mosaic.version = 11 : i64} {
  func.func @kernel(%arg0: i32, %arg1: i32, %arg2: memref<16x128xf32, #tpu.memory_space<vmem>>, %arg3: memref<128x128xf32, #tpu.memory_space<vmem>>, %arg4: memref<1x128xf32, #tpu.memory_space<vmem>>, %arg5: memref<16x128xf32, #tpu.memory_space<vmem>>) attributes {dimension_semantics = [#tpu.dimension_semantics<parallel>, #tpu.dimension_semantics<parallel>], iteration_bounds = array<i64: 1, 1>, scalar_prefetch = 0 : i64, scratch_operands = 0 : i64, tpu.core_type = #tpu.core_type<tc>, window_params = [{transform_indices = @transform_0, window_bounds = array<i64: 16, 128>}, {transform_indices = @transform_1, window_bounds = array<i64: 128, 128>}, {transform_indices = @transform_2, window_bounds = array<i64: 1, 128>}, {transform_indices = @transform_3, window_bounds = array<i64: 16, 128>}]} {
    %c0 = arith.constant 0 : index
    %c0_0 = arith.constant 0 : index
    %0 = vector.load %arg2[%c0, %c0_0] : memref<16x128xf32, #tpu.memory_space<vmem>>, vector<16x128xf32>
    %c0_1 = arith.constant 0 : index
    %c0_2 = arith.constant 0 : index
    %1 = vector.load %arg3[%c0_1, %c0_2] : memref<128x128xf32, #tpu.memory_space<vmem>>, vector<128x128xf32>
    %cst = arith.constant dense<0.000000e+00> : vector<16x128xf32>
    %2 = tpu.matmul %0, %1, %cst {dimension_numbers = #tpu.dot_dimension_numbers<[1], [1], [0], [0], [0, 0, 1, 0], [], []>} : vector<16x128xf32>, vector<128x128xf32>, vector<16x128xf32> -> vector<16x128xf32>
    %c0_3 = arith.constant 0 : index
    %c0_4 = arith.constant 0 : index
    %3 = vector.load %arg4[%c0_3, %c0_4] : memref<1x128xf32, #tpu.memory_space<vmem>>, vector<1x128xf32>
    %4 = vector.broadcast %3 : vector<1x128xf32> to vector<16x128xf32>
    %5 = arith.addf %2, %4 : vector<16x128xf32>
    %c0_5 = arith.constant 0 : index
    %c0_6 = arith.constant 0 : index
    %6 = vector.load %arg5[%c0_5, %c0_6] : memref<16x128xf32, #tpu.memory_space<vmem>>, vector<16x128xf32>
    tpu.vector_store %arg5[%c0_5, %c0_6], %5 {strides = array<i32>} : memref<16x128xf32, #tpu.memory_space<vmem>>, vector<16x128xf32>,
    return
  }
  func.func @transform_0(%arg0: i32, %arg1: i32) -> (i32, i32) {
    %c0_i32 = arith.constant 0 : i32
    %c0_i32_0 = arith.constant 0 : i32
    return %arg0, %c0_i32 : i32, i32
  }
  func.func @transform_1(%arg0: i32, %arg1: i32) -> (i32, i32) {
    %c0_i32 = arith.constant 0 : i32
    %c0_i32_0 = arith.constant 0 : i32
    return %arg1, %c0_i32 : i32, i32
  }
  func.func @transform_2(%arg0: i32, %arg1: i32) -> (i32, i32) {
    %c0_i32 = arith.constant 0 : i32
    %c0_i32_0 = arith.constant 0 : i32
    return %c0_i32, %arg1 : i32, i32
  }
  func.func @transform_3(%arg0: i32, %arg1: i32) -> (i32, i32) {
    %c0_i32 = arith.constant 0 : i32
    return %arg0, %arg1 : i32, i32
  }
}

</mosaic_0001>

<bundles_post_ra>
// kernel: projection_forward.1
= control target key start
LH: loop header
LB: loop body
LE: loop exit
PB: predicated region body
PF: predicated region fallthrough
CT: control target
= control target key end

     0   :  { %8 = vsyncpa [#allocation3], 0  ;;  %s334_s0 = inlined_call_operand.hbm [shape: f32[16,128], index: 0, kind: input, shape index: {}]   ;;  %s335_s1 = inlined_call_operand.hbm [shape: f32[128,128], index: 1, kind: input, shape index: {}]   ;;  %s336_s2 = inlined_call_operand.vmem [shape: f32[1,128], index: 2, kind: input, shape index: {}]   ;;  %s337_s3 = inlined_call_operand.hbm [shape: f32[16,128], index: 3, kind: output, shape index: {}]  }
   0x1   :  { %9 = vsyncpa [#allocation6], 0 }
   0x2   :  { %10 = vsyncpa [#allocation4], 0  ;;  %s288_s12 = smov [#allocation2]  }
   0x3   :  { %s16_s13 = sshll.u32 %s288_s12, 4  ;;  %s17_s13 = int_to_ptr.vmem [resolvable:$true] %s16_s13 }
   0x4   :  { %s230_s14 = scalar_lea.vmem %s17_s13, 256  ;;  %p235_p1 = scmp.lt.s32.totalorder %s17_s13, %s17_s13 }
   0x5   :  { %p231_p0 = scmp.ne.s32.totalorder %s17_s13, %s230_s14  ;;  %p236_p2 = scmp.lt.s32.totalorder %s230_s14, %s230_s14 }
   0x7   :  { %p237_p3 = por %p236_p2, %p235_p1 }
   0x9   :  { %p238_p4 = pnand %p237_p3, %p231_p0 }
   0xb   :  { %241 = shalt.err (!%p238_p4)
}
   0xc   :  { %s289_s15 = smov 128   ;;  %s290_s16 = smov 8  }
   0xd   :  { %22 = dma.hbm_to_vmem [thread:$0]  %s334_s0, 256, %s17_s13, [#allocation3], %s289_s15, %s289_s15, %s290_s16  }
   0xe   :  { %s291_s19 = smov [#allocation5]  }
   0xf   :  { %s28_s20 = sshll.u32 %s291_s19, 4  ;;  %s29_s20 = int_to_ptr.vmem [resolvable:$true] %s28_s20 }
  0x10   :  { %s250_s21 = scalar_lea.vmem %s29_s20, 2048  ;;  %p255_p6 = scmp.lt.s32.totalorder %s29_s20, %s29_s20 }
  0x11   :  { %p251_p5 = scmp.ne.s32.totalorder %s29_s20, %s250_s21  ;;  %p256_p7 = scmp.lt.s32.totalorder %s250_s21, %s250_s21 }
  0x13   :  { %p257_p8 = por %p256_p7, %p255_p6 }
  0x15   :  { %p258_p9 = pnand %p257_p8, %p251_p5 }
  0x17   :  { %261 = shalt.err (!%p258_p9)
}
  0x18   :  { %34 = dma.hbm_to_vmem [thread:$0]  %s335_s1, 2048, %s29_s20, [#allocation6], %s289_s15, %s289_s15, %s290_s16  }
  0x19   :  { %282 = dma.done.wait [#allocation3], 256  }
  0x1a   :  { %283 = vsyncadd [#allocation3], 4294967040 }
  0x1b   :  { %284 = dma.done.wait [#allocation6], 2048  }
  0x1c   :  { %285 = vsyncadd [#allocation6], 4294965248  ;;  %v60_v0 = vld [vmem:[#allocation5 + $0x78] sm:$0xff]  ;;  %v59_v1 = vld [vmem:[#allocation5 + $0x70] sm:$0xff]  ;;  %s292_s24 = smov [#allocation7]  }
  0x1d   :  { %182 = vmatprep.subr.mxu0 %v60_v0  ;;  %v58_v2 = vld [vmem:[#allocation5 + $0x68] sm:$0xff]  ;;  %v43_v3 = vld [vmem:[#allocation2] sm:$0xff]  ;;  %v57_v4 = vld [vmem:[#allocation5 + $0x60] sm:$0xff]  ;;  %s150_s25 = sshll.u32 %s292_s24, 4  ;;  %s151_s25 = int_to_ptr.vmem [resolvable:$true] %s150_s25 }
  0x1e   :  { %183 = vmatpush3.xpose.msra.mxu0 %v60_v0  ;;  %214 = vmatprep.mubr.f32.mxu0 %v43_v3  ;;  %v56_v5 = vld [vmem:[#allocation5 + $0x58] sm:$0xff]  ;;  %v55_v6 = vld [vmem:[#allocation5 + $0x50] sm:$0xff]  ;;  %v54_v7 = vld [vmem:[#allocation5 + $0x48] sm:$0xff]  ;;  %s262_s26 = scalar_lea.vmem %s151_s25, 256  ;;  %p267_p11 = scmp.lt.s32.totalorder %s151_s25, %s151_s25 }
  0x1f   :  { %184 = vmatprep.subr.mxu0 %v59_v1  ;;  %v53_v8 = vld [vmem:[#allocation5 + $0x40] sm:$0xff]  ;;  %v52_v9 = vld [vmem:[#allocation5 + $0x38] sm:$0xff]  ;;  %v51_v10 = vld [vmem:[#allocation5 + $0x30] sm:$0xff]  ;;  %p263_p10 = scmp.ne.s32.totalorder %s151_s25, %s262_s26  ;;  %p268_p12 = scmp.lt.s32.totalorder %s262_s26, %s262_s26 }
  0x20   :  { %v50_v11 = vld [vmem:[#allocation5 + $0x28] sm:$0xff]  ;;  %v49_v12 = vld [vmem:[#allocation5 + $0x20] sm:$0xff]  ;;  %v48_v13 = vld [vmem:[#allocation5 + $0x18] sm:$0xff] }
  0x21   :  { %v47_v14 = vld [vmem:[#allocation5 + $0x10] sm:$0xff]  ;;  %v46_v15 = vld [vmem:[#allocation5 + $0x8] sm:$0xff]  ;;  %v45_v16 = vld [vmem:[#allocation5] sm:$0xff]  ;;  %p269_p13 = por %p268_p12, %p267_p11 }
  0x22   :  { %185 = vmatpush3.xpose.msra.mxu0 %v59_v1  ;;  %v44_v17 = vld [vmem:[#allocation2 + $0x8] sm:$0xff]  ;;  %v163_v18 = vld [vmem:[%s336_s2] ss:$0 sm:$0xff] }
  0x23   :  { %186 = vmatprep.subr.mxu0 %v58_v2  ;;  %p270_p0 = pnand %p269_p13, %p263_p10 }
  0x26   :  { %187 = vmatpush3.xpose.msra.mxu0 %v58_v2 }
  0x27   :  { %188 = vmatprep.subr.mxu0 %v57_v4 }
  0x2a   :  { %189 = vmatpush3.xpose.msra.mxu0 %v57_v4 }
  0x2b   :  { %190 = vmatprep.subr.mxu0 %v56_v5 }
  0x2e   :  { %191 = vmatpush3.xpose.msra.mxu0 %v56_v5 }
  0x2f   :  { %192 = vmatprep.subr.mxu0 %v55_v6 }
  0x32   :  { %193 = vmatpush3.xpose.msra.mxu0 %v55_v6 }
  0x33   :  { %194 = vmatprep.subr.mxu0 %v54_v7 }
  0x36   :  { %195 = vmatpush3.xpose.msra.mxu0 %v54_v7 }
  0x37   :  { %196 = vmatprep.subr.mxu0 %v53_v8 }
  0x3a   :  { %197 = vmatpush3.xpose.msra.mxu0 %v53_v8 }
  0x3b   :  { %198 = vmatprep.subr.mxu0 %v52_v9 }
  0x3e   :  { %199 = vmatpush3.xpose.msra.mxu0 %v52_v9 }
  0x3f   :  { %200 = vmatprep.subr.mxu0 %v51_v10 }
  0x42   :  { %201 = vmatpush3.xpose.msra.mxu0 %v51_v10 }
  0x43   :  { %202 = vmatprep.subr.mxu0 %v50_v11 }
  0x46   :  { %203 = vmatpush3.xpose.msra.mxu0 %v50_v11 }
  0x47   :  { %204 = vmatprep.subr.mxu0 %v49_v12 }
  0x4a   :  { %205 = vmatpush3.xpose.msra.mxu0 %v49_v12 }
  0x4b   :  { %206 = vmatprep.subr.mxu0 %v48_v13 }
  0x4e   :  { %207 = vmatpush3.xpose.msra.mxu0 %v48_v13 }
  0x4f   :  { %208 = vmatprep.subr.mxu0 %v47_v14 }
  0x52   :  { %209 = vmatpush3.xpose.msra.mxu0 %v47_v14 }
  0x53   :  { %210 = vmatprep.subr.mxu0 %v46_v15 }
  0x56   :  { %211 = vmatpush3.xpose.msra.mxu0 %v46_v15 }
  0x57   :  { %212 = vmatprep.subr.mxu0 %v45_v16 }
  0x5a   :  { %213 = vmatpush3.xpose.msra.mxu0 %v45_v16 }
  0x5d   :  { %215 = vmatmul.mubr.f32.vlgmr.msra.gmra.mxu0 %v44_v17 }
 0x11d   :  { %v216_v19 = vpop.f32.mrf.mxu0 }
 0x11e   :  { %v140_v20 = vadd.f32 %v216_v19, %v163_v18 }
 0x11f   :  { %v134_v21 = vpop.f32.mrf.mxu0 }
 0x120   :  { %144 = vst [vmem:[#allocation7 + $0x8] sm:$0xff] %v140_v20  ;;  %v135_v22 = vadd.f32 %v163_v18, %v134_v21 }
 0x122   :  { %143 = vst [vmem:[#allocation7] sm:$0xff] %v135_v22 }
 0x123   :  { %273 = shalt.err (!%p270_p0)
}
 0x124   :  { %156 = dma.vmem_to_hbm [thread:$0]  %s151_s25, 256, %s337_s3, [#allocation4], %s289_s15, %s289_s15, %s290_s16  }
 0x125   :  { %286 = dma.done.wait [#allocation4], 256  }
 0x126   :  { %287 = vsyncadd [#allocation4], 4294967040 }
 0x127   :  { %160 = vsyncpa [#allocation3], 1 }
 0x128   :  { %161 = vsyncpa [#allocation6], 1 }
 0x129   :  { %162 = vsyncpa [#allocation4], 1 }

</bundles_post_ra>
